<compile_context>
chip_gen: v6e
topology: v6e:2x2x1
jax: 0.10.0
libtpu: 0.0.40
codegen_flags: <defaults>
</compile_context>

<pallas_src>
from functools import partial

import jax
import jax.numpy as jnp
from jax.experimental import pallas as pl
from jax.experimental.pallas import tpu as pltpu

LANES = 128
SUBLANES = 8
# ~1 MiB of HBM traffic per input tile; 2 inputs x 2 pipeline buffers
# = 4 MiB in-flight VMEM regardless of dtype -- safe on v5e (16 MiB scoped
# default), v6e (32 MiB) and v7x (32 of 64 MiB physical).
TARGET_TILE_BYTES = 1 << 20
# Leading "parallel" grid axis: both TensorCores of a v7x chip each take half
# of the row range; on single-TC chips it is just a serial outer loop.
NUM_SPLITS = 2


def _cdiv(a, b):
    return -(-a // b)


def _round_up(x, m):
    return _cdiv(x, m) * m


def _make_sse_kernel(total_rows, tile_rows, blocks_per_split, needs_mask):
    """Sum-of-squared-error kernel over a (num_splits, blocks_per_split) grid."""

    def kernel(p_ref, l_ref, o_ref):
        c = pl.program_id(0)   # split axis ("parallel")
        i = pl.program_id(1)   # row-tile axis within split ("arbitrary")

        @pl.when(i == 0)
        def _():
            o_ref[...] = jnp.zeros_like(o_ref)

        # Cast per-tile inside the kernel (VPU work hidden under the input
        # DMAs); inputs stream from HBM in their original dtype.
        d = p_ref[...].astype(jnp.float32) - l_ref[...].astype(jnp.float32)
        sq = d * d

        if needs_mask:
            # Zero out rows past the real end of the data: the partial tail
            # tile (possibly containing garbage/NaN from the OOB part of the
            # edge block) and any logical tiles past the last real block (the
            # index map clamps those onto the final in-bounds block).
            row_in_tile = jax.lax.broadcasted_iota(
                jnp.int32, (tile_rows, LANES), 0)
            logical_row = (c * blocks_per_split + i) * tile_rows + row_in_tile
            sq = jnp.where(logical_row < total_rows, sq, 0.0)

        # Lane-dense partial accumulation: (tile_rows,128) -> (8,128) via pure
        # VPU vreg adds; the only cross-lane reduce happens once, in the
        # wrapper.  The output block stays resident in VMEM across axis 1.
        o_ref[...] += jnp.sum(
            sq.reshape(tile_rows // SUBLANES, SUBLANES, LANES), axis=0)

    return kernel


@partial(jax.jit, static_argnames=("max_tile_rows",))
def mse_loss_pallas(pred, label, *, max_tile_rows=None):
    assert pred.shape == label.shape, "pred/label shape mismatch"
    n_elems = pred.size
    if n_elems == 0:
        # torch.nn.MSELoss('mean') over an empty tensor is NaN (0/0).
        return jnp.float32(jnp.nan)

    # Pure reshapes of contiguous arrays: no HBM copy, no dtype upcast.
    p = pred.reshape(-1)
    l = label.reshape(-1)

    rem = n_elems % LANES
    if rem:
        # Rare fallback (element count not a lane multiple): pad by <128
        # zeros.  Zero diffs contribute nothing to the SSE.
        p = jnp.pad(p, (0, LANES - rem))
        l = jnp.pad(l, (0, LANES - rem))

    rows = p.size // LANES
    p2d = p.reshape(rows, LANES)
    l2d = l.reshape(rows, LANES)

    # Dtype-aware row-tile size (~1 MiB per input tile), multiple of 8
    # sublanes, capped to the (rounded-up) row count.  Never degraded for
    # awkward row counts -- the ragged tail is masked inside the kernel.
    itemsize = max(jnp.dtype(pred.dtype).itemsize,
                   jnp.dtype(label.dtype).itemsize)
    if max_tile_rows is None:
        max_tile_rows = max(SUBLANES, TARGET_TILE_BYTES // (LANES * itemsize))
    max_tile_rows = _round_up(max_tile_rows, SUBLANES)
    tile_rows = min(max_tile_rows, _round_up(rows, SUBLANES))

    blocks_total = _cdiv(rows, tile_rows)
    num_splits = NUM_SPLITS if blocks_total >= NUM_SPLITS else 1
    blocks_per_split = _cdiv(blocks_total, num_splits)
    needs_mask = (num_splits * blocks_per_split * tile_rows) != rows

    def in_map(c, i):
        # Clamp logical blocks past the end onto the last real block; their
        # contribution is zeroed by the in-kernel row mask.
        return (jnp.minimum(c * blocks_per_split + i, blocks_total - 1), 0)

    out_rows = num_splits * SUBLANES
    in_bytes = (jnp.dtype(pred.dtype).itemsize
                + jnp.dtype(label.dtype).itemsize) * n_elems

    partials = pl.pallas_call(
        _make_sse_kernel(rows, tile_rows, blocks_per_split, needs_mask),
        out_shape=jax.ShapeDtypeStruct((out_rows, LANES), jnp.float32),
        grid_spec=pltpu.PrefetchScalarGridSpec(
            num_scalar_prefetch=0,
            grid=(num_splits, blocks_per_split),
            in_specs=[
                pl.BlockSpec((tile_rows, LANES), in_map),
                pl.BlockSpec((tile_rows, LANES), in_map),
            ],
            out_specs=pl.BlockSpec((SUBLANES, LANES), lambda c, i: (c, 0)),
        ),
        compiler_params=pltpu.CompilerParams(
            dimension_semantics=("parallel", "arbitrary"),
        ),
        cost_estimate=pl.CostEstimate(
            flops=3 * n_elems,
            transcendentals=0,
            bytes_accessed=in_bytes + out_rows * LANES * 4,
        ),
    )(p2d, l2d)

    # Final reduction over <= 2 KiB of lane-dense partials + mean divide.
    return jnp.sum(partials) / jnp.float32(n_elems)


def my_loss_forward(pred, label):
    """Mirrors MyLoss.forward: returns (loss, loss_msg dict)."""
    mse = mse_loss_pallas(pred, label)
    loss = mse
    loss_msg = {"mseloss": mse, "loss_total": loss}
    return loss, loss_msg


if __name__ == "__main__":
    key = jax.random.PRNGKey(0)
    k1, k2, k3, k4, k5, k6 = jax.random.split(key, 6)

    # Primary case: shapes consistent with a dense-prediction MSE loss.
    pred = jax.random.normal(k1, (2, 4, 16, 16), dtype=jnp.float32)
    label = jax.random.normal(k2, (2, 4, 16, 16), dtype=jnp.float32)

    loss, loss_msg = my_loss_forward(pred, label)
    loss = jax.block_until_ready(loss)

    ref = jnp.mean((pred - label) ** 2)
    assert jnp.allclose(loss, ref, rtol=1e-6, atol=1e-6), (loss, ref)
    assert jnp.allclose(loss_msg["loss_total"], ref, rtol=1e-6, atol=1e-6)

    # Secondary case: exercises the ragged-tail mask, the clamped index map
    # and the 2-way "parallel" split (small tile forces multiple row blocks).
    pred2 = jax.random.normal(k3, (2, 4, 16, 18), dtype=jnp.float32)
    label2 = jax.random.normal(k4, (2, 4, 16, 18), dtype=jnp.float32)
    loss2 = jax.block_until_ready(
        mse_loss_pallas(pred2, label2, max_tile_rows=8))
    ref2 = jnp.mean((pred2 - label2) ** 2)
    assert jnp.allclose(loss2, ref2, rtol=1e-6, atol=1e-6), (loss2, ref2)

    # Tertiary case: non-lane-multiple element count + bf16 inputs (dtype-aware
    # tiling, in-kernel f32 upcast).
    pred3 = jax.random.normal(k5, (3, 5, 7), dtype=jnp.bfloat16)
    label3 = jax.random.normal(k6, (3, 5, 7), dtype=jnp.bfloat16)
    loss3 = jax.block_until_ready(mse_loss_pallas(pred3, label3))
    ref3 = jnp.mean((pred3.astype(jnp.float32) - label3.astype(jnp.float32)) ** 2)
    assert jnp.allclose(loss3, ref3, rtol=1e-3, atol=1e-3), (loss3, ref3)

    print("KERNEL_OK")
</pallas_src>

<mosaic_0001>
module attributes {stable_mosaic.version = 11 : i64} {
  func.func @kernel(%arg0: i32, %arg1: i32, %arg2: memref<16x128xf32, #tpu.memory_space<vmem>>, %arg3: memref<16x128xf32, #tpu.memory_space<vmem>>, %arg4: memref<8x128xf32, #tpu.memory_space<vmem>>) attributes {dimension_semantics = [#tpu.dimension_semantics<parallel>, #tpu.dimension_semantics<arbitrary>], iteration_bounds = array<i64: 1, 1>, scalar_prefetch = 0 : i64, scratch_operands = 0 : i64, tpu.core_type = #tpu.core_type<tc>, window_params = [{transform_indices = @transform_0, window_bounds = array<i64: 16, 128>}, {transform_indices = @transform_1, window_bounds = array<i64: 16, 128>}, {transform_indices = @transform_2, window_bounds = array<i64: 8, 128>}]} {
    %c0_i32 = arith.constant 0 : i32
    %0 = arith.cmpi eq, %arg1, %c0_i32 : i32
    %1 = arith.extui %0 : i1 to i32
    %c0_i32_0 = arith.constant 0 : i32
    %2 = arith.cmpi ne, %1, %c0_i32_0 : i32
    scf.if %2 {
      %cst_8 = arith.constant 0.000000e+00 : f32
      %12 = vector.broadcast %cst_8 : f32 to vector<8x128xf32>
      %c0_9 = arith.constant 0 : index
      %c0_10 = arith.constant 0 : index
      %13 = vector.load %arg4[%c0_9, %c0_10] : memref<8x128xf32, #tpu.memory_space<vmem>>, vector<8x128xf32>
      tpu.vector_store %arg4[%c0_9, %c0_10], %12 {strides = array<i32>} : memref<8x128xf32, #tpu.memory_space<vmem>>, vector<8x128xf32>,
    } else {
    }
    %c0 = arith.constant 0 : index
    %c0_1 = arith.constant 0 : index
    %3 = vector.load %arg2[%c0, %c0_1] : memref<16x128xf32, #tpu.memory_space<vmem>>, vector<16x128xf32>
    %c0_2 = arith.constant 0 : index
    %c0_3 = arith.constant 0 : index
    %4 = vector.load %arg3[%c0_2, %c0_3] : memref<16x128xf32, #tpu.memory_space<vmem>>, vector<16x128xf32>
    %5 = arith.subf %3, %4 : vector<16x128xf32>
    %6 = arith.mulf %5, %5 : vector<16x128xf32>
    %c0_4 = arith.constant 0 : index
    %c0_5 = arith.constant 0 : index
    %7 = vector.load %arg4[%c0_4, %c0_5] : memref<8x128xf32, #tpu.memory_space<vmem>>, vector<8x128xf32>
    %8 = vector.shape_cast %6 : vector<16x128xf32> to vector<2x8x128xf32>
    %cst = arith.constant dense<0.000000e+00> : vector<8x128xf32>
    %9 = vector.multi_reduction <add>, %8, %cst [0] : vector<2x8x128xf32> to vector<8x128xf32>
    %10 = arith.addf %7, %9 : vector<8x128xf32>
    %c0_6 = arith.constant 0 : index
    %c0_7 = arith.constant 0 : index
    %11 = vector.load %arg4[%c0_6, %c0_7] : memref<8x128xf32, #tpu.memory_space<vmem>>, vector<8x128xf32>
    tpu.vector_store %arg4[%c0_6, %c0_7], %10 {strides = array<i32>} : memref<8x128xf32, #tpu.memory_space<vmem>>, vector<8x128xf32>,
    return
  }
  func.func @transform_0(%arg0: i32, %arg1: i32) -> (i32, i32) {
    %c1_i32 = arith.constant 1 : i32
    %0 = arith.muli %arg0, %c1_i32 : i32
    %1 = arith.addi %0, %arg1 : i32
    %c0_i32 = arith.constant 0 : i32
    %2 = arith.minsi %1, %c0_i32 : i32
    %c0_i32_0 = arith.constant 0 : i32
    %c0_i32_1 = arith.constant 0 : i32
    return %2, %c0_i32_0 : i32, i32
  }
  func.func @transform_1(%arg0: i32, %arg1: i32) -> (i32, i32) {
    %c1_i32 = arith.constant 1 : i32
    %0 = arith.muli %arg0, %c1_i32 : i32
    %1 = arith.addi %0, %arg1 : i32
    %c0_i32 = arith.constant 0 : i32
    %2 = arith.minsi %1, %c0_i32 : i32
    %c0_i32_0 = arith.constant 0 : i32
    %c0_i32_1 = arith.constant 0 : i32
    return %2, %c0_i32_0 : i32, i32
  }
  func.func @transform_2(%arg0: i32, %arg1: i32) -> (i32, i32) {
    %c0_i32 = arith.constant 0 : i32
    %c0_i32_0 = arith.constant 0 : i32
    return %arg0, %c0_i32 : i32, i32
  }
}

</mosaic_0001>

<bundles_post_ra>
// kernel: mse_loss_pallas.1
= control target key start
LH: loop header
LB: loop body
LE: loop exit
PB: predicated region body
PF: predicated region fallthrough
CT: control target
= control target key end

     0   :  { %s139_s0 = inlined_call_operand.vmem [shape: f32[16,128], index: 0, kind: input, shape index: {}]   ;;  %s140_s1 = inlined_call_operand.vmem [shape: f32[16,128], index: 1, kind: input, shape index: {}]   ;;  %s141_s2 = inlined_call_operand.vmem [shape: f32[8,128], index: 2, kind: output, shape index: {}]  }
   0x1   :  { %v80_v0 = vld [vmem:[%s139_s0] sm:$0xff]  ;;  %v81_v1 = vld [vmem:[%s139_s0 + $0x8] sm:$0xff] }
   0x2   :  { %v82_v2 = vld [vmem:[%s140_s1] sm:$0xff]  ;;  %v83_v3 = vld [vmem:[%s140_s1 + $0x8] sm:$0xff] }
   0x3   :  { %v84_v4 = vsub.f32 %v80_v0, %v82_v2  ;;  %v85_v5 = vsub.f32 %v81_v1, %v83_v3 }
   0x5   :  { %v86_v6 = vmul.f32 %v84_v4, %v84_v4  ;;  %v87_v7 = vmul.f32 %v85_v5, %v85_v5 }
   0x7   :  { %v89_v8 = vadd.f32 %v87_v7, %v86_v6 }
   0x9   :  { %91 = vst [vmem:[%s141_s2] sm:$0xff] %v89_v8 }

</bundles_post_ra>
